<compile_context>
chip_gen: v5e
topology: v5e:2x2
jax: 0.10.0
libtpu: 0.0.40
codegen_flags: <defaults>
</compile_context>

<pallas_src>
import functools

import jax
import jax.numpy as jnp
from jax import lax
from jax.experimental import pallas as pl
from jax.experimental.pallas import tpu as pltpu

_LANE = 128
_SUBLANE = 8


def _round_up(x, m):
    return (x + m - 1) // m * m


def _vmem_limit_bytes():
    """Per-generation VMEM limit (128 MiB on v5e/v6e, 64 MiB physical on v7x)."""
    try:
        cap = pltpu.get_tpu_info().vmem_capacity_bytes
    except Exception:
        cap = 64 * 1024 * 1024          # conservative (v7x-sized) fallback
    return int(min(cap * 3 // 4, 100 * 1024 * 1024))


def _binarize_weight(weight_oihw):
    """scale (Cout,) f32 and sign(W) laid out as (K, K, Cin, Cout)."""
    w = weight_oihw.astype(jnp.float32)
    scale = jnp.mean(jnp.abs(w), axis=(1, 2, 3))
    w_sign = jnp.transpose(jnp.sign(w), (2, 3, 1, 0))     # (K, K, Cin, Cout), exact +/-1
    return w_sign, scale


# ---------------------------------------------------------------------------
# Path A: wrapper-side im2col (packed contraction) -> one matmul per row tile.
# Used for small Cin (contraction K*K*Cin padded only once to 128) and for
# stride != 1 (no strided sublane loads in the kernel).
# ---------------------------------------------------------------------------
def _matmul_scale_kernel(x_ref, w_ref, s_ref, o_ref):
    # x_ref: (1, tm, KKC_p) bf16 im2col rows     w_ref: (KKC_p, Cout_p) bf16 signs
    # s_ref: (1, Cout_p) f32 scale               o_ref: (1, tm, Cout_p)
    acc = jnp.dot(x_ref[0], w_ref[...], preferred_element_type=jnp.float32)
    o_ref[0] = (acc * s_ref[...]).astype(o_ref.dtype)


def _conv_im2col(x_nchw, w_sign_kkio, scale, *, K, stride, padding, H_out, W_out):
    N, Cin, H, W = x_nchw.shape
    Cout = scale.shape[0]
    KKC = K * K * Cin
    KKC_p = _round_up(KKC, _LANE)
    Cout_p = _round_up(Cout, _LANE)

    # Weight matrix: rows ordered (kh, kw, c) — must match the im2col packing.
    w_mat = w_sign_kkio.reshape(KKC, Cout)
    w_mat = jnp.pad(w_mat, ((0, KKC_p - KKC), (0, Cout_p - Cout))).astype(jnp.bfloat16)
    scale_p = jnp.pad(scale, (0, Cout_p - Cout)).reshape(1, Cout_p)

    # Wrapper-side im2col: spatial pad, NHWC, gather the K*K taps channel-minor.
    xp = jnp.pad(x_nchw, ((0, 0), (0, 0), (padding, padding), (padding, padding)))
    xp = jnp.transpose(xp, (0, 2, 3, 1))                   # (N, H_pad, W_pad, Cin)
    cols = []
    for kh in range(K):
        for kw in range(K):
            cols.append(lax.slice(
                xp, (0, kh, kw, 0),
                (N, kh + (H_out - 1) * stride + 1, kw + (W_out - 1) * stride + 1, Cin),
                (1, stride, stride, 1)))                   # (N, H_out, W_out, Cin)
    xcol = jnp.concatenate(cols, axis=-1).reshape(N, H_out * W_out, KKC)

    # Row tiling: target M tiles ~512 rows, 8-aligned, cdiv-padded.
    M = H_out * W_out
    n_tiles = pl.cdiv(M, 512)
    tm = _round_up(pl.cdiv(M, n_tiles), _SUBLANE)
    M_p = tm * n_tiles
    xcol = jnp.pad(xcol, ((0, 0), (0, M_p - M), (0, KKC_p - KKC))).astype(jnp.bfloat16)

    out = pl.pallas_call(
        _matmul_scale_kernel,
        out_shape=jax.ShapeDtypeStruct((N, M_p, Cout_p), x_nchw.dtype),
        grid=(N, n_tiles),
        in_specs=[
            pl.BlockSpec((1, tm, KKC_p), lambda n, t: (n, t, 0)),
            pl.BlockSpec((KKC_p, Cout_p), lambda n, t: (0, 0)),   # resident weights
            pl.BlockSpec((1, Cout_p), lambda n, t: (0, 0)),
        ],
        out_specs=pl.BlockSpec((1, tm, Cout_p), lambda n, t: (n, t, 0)),
        compiler_params=pltpu.CompilerParams(
            dimension_semantics=("parallel", "parallel"),
            vmem_limit_bytes=_vmem_limit_bytes()),
    )(xcol, w_mat, scale_p)

    out = out[:, :M, :Cout].reshape(N, H_out, W_out, Cout)
    return jnp.transpose(out, (0, 3, 1, 2))                # NHWC -> NCHW


# ---------------------------------------------------------------------------
# Path B: shift-and-accumulate over the K*K taps on a manually DMA'd halo
# row-slab.  No im2col scratch, input stays in HBM, f32 VMEM accumulator.
# Used for wide channels (Cin >= 32) with stride == 1.
# ---------------------------------------------------------------------------
def _shift_acc_kernel(x_hbm, w_ref, s_ref, o_ref, xslab, acc_ref, sem, *,
                      K, th, W_out_p, Cin_p):
    n = pl.program_id(0)
    t = pl.program_id(1)
    rows = th + K - 1
    r0 = pl.multiple_of(t * th, th)

    # Halo slab fetch: only (th + K - 1) input rows live in VMEM at a time.
    # TODO(synk): double-buffer this slab DMA to overlap it with the matmuls.
    cp = pltpu.make_async_copy(x_hbm.at[n, pl.ds(r0, rows)], xslab, sem)
    cp.start()
    cp.wait()

    first = True
    for kh in range(K):
        for kw in range(K):
            patch = xslab[kh:kh + th, kw:kw + W_out_p, :]          # (th, W_out_p, Cin_p)
            contrib = jnp.dot(patch.reshape(th * W_out_p, Cin_p),  # W_out_p % 8 == 0
                              w_ref[kh * K + kw],
                              preferred_element_type=jnp.float32)
            if first:
                acc_ref[...] = contrib
                first = False
            else:
                acc_ref[...] += contrib

    o_ref[0] = (acc_ref[...] * s_ref[...]).astype(o_ref.dtype)


def _conv_shift_acc(x_nchw, w_sign_kkio, scale, *, K, padding, H_out, W_out):
    N, Cin, H, W = x_nchw.shape
    Cout = scale.shape[0]
    Cin_p = _round_up(Cin, _LANE)
    Cout_p = _round_up(Cout, _LANE)
    W_out_p = _round_up(W_out, _SUBLANE)
    out_itemsize = x_nchw.dtype.itemsize

    # Row tile: target M = th * W_out_p ~= 512, shrink if VMEM estimate too big.
    th = max(1, min(H_out, 512 // W_out_p))
    budget = _vmem_limit_bytes() // 3

    def _tile_bytes(th_):
        slab = (th_ + K - 1) * _round_up(W_out_p + K - 1, _SUBLANE) * Cin_p * 2
        acc = th_ * W_out_p * Cout_p * 4
        outb = 2 * th_ * W_out_p * Cout_p * out_itemsize
        return slab + acc + outb

    while th > 1 and _tile_bytes(th) > budget:
        th = (th + 1) // 2

    H_out_p = _round_up(H_out, th)
    n_row_tiles = H_out_p // th

    # Weights: (K,K,Cin,Cout) -> padded (K*K, Cin_p, Cout_p) bf16, lane = Cout_p.
    w_p = jnp.pad(w_sign_kkio,
                  ((0, 0), (0, 0), (0, Cin_p - Cin), (0, Cout_p - Cout)))
    w_p = w_p.reshape(K * K, Cin_p, Cout_p).astype(jnp.bfloat16)
    scale_p = jnp.pad(scale, (0, Cout_p - Cout)).reshape(1, Cout_p)

    # Input: NHWC, spatial zero-pad (conv pad + alignment pad), channel pad, bf16.
    H_in_p = H_out_p + K - 1
    W_in_p = _round_up(W_out_p + K - 1, _SUBLANE)
    xp = jnp.transpose(x_nchw, (0, 2, 3, 1))               # (N, H, W, Cin)
    xp = jnp.pad(xp, ((0, 0),
                      (padding, H_in_p - H - padding),
                      (padding, W_in_p - W - padding),
                      (0, Cin_p - Cin))).astype(jnp.bfloat16)

    kernel = functools.partial(_shift_acc_kernel, K=K, th=th,
                               W_out_p=W_out_p, Cin_p=Cin_p)

    out = pl.pallas_call(
        kernel,
        out_shape=jax.ShapeDtypeStruct((N, H_out_p * W_out_p, Cout_p), x_nchw.dtype),
        grid=(N, n_row_tiles),
        in_specs=[
            pl.BlockSpec(memory_space=pl.ANY),             # image stays in HBM
            pl.BlockSpec((K * K, Cin_p, Cout_p), lambda n, t: (0, 0, 0)),
            pl.BlockSpec((1, Cout_p), lambda n, t: (0, 0)),
        ],
        out_specs=pl.BlockSpec((1, th * W_out_p, Cout_p), lambda n, t: (n, t, 0)),
        scratch_shapes=[
            pltpu.VMEM((th + K - 1, W_in_p, Cin_p), jnp.bfloat16),   # halo slab
            pltpu.VMEM((th * W_out_p, Cout_p), jnp.float32),         # f32 accumulator
            pltpu.SemaphoreType.DMA,
        ],
        compiler_params=pltpu.CompilerParams(
            dimension_semantics=("parallel", "parallel"),
            vmem_limit_bytes=_vmem_limit_bytes()),
    )(xp, w_p, scale_p)

    out = out.reshape(N, H_out_p, W_out_p, Cout_p)[:, :H_out, :W_out, :Cout]
    return jnp.transpose(out, (0, 3, 1, 2))                # NHWC -> NCHW


# ---------------------------------------------------------------------------
# Public entry point + reference
# ---------------------------------------------------------------------------
def hard_binary_conv(x_nchw, weight_oihw, *, stride=1, padding=1):
    """HardBinaryConv forward.  x: (N, Cin, H, W), weight: (Cout, Cin, K, K)."""
    N, Cin, H, W = x_nchw.shape
    Cout, _, K, _ = weight_oihw.shape
    H_out = (H + 2 * padding - K) // stride + 1
    W_out = (W + 2 * padding - K) // stride + 1

    w_sign, scale = _binarize_weight(weight_oihw)

    if Cin < 32 or stride != 1:
        # Small contraction (or strided): pack it tight in the wrapper.
        return _conv_im2col(x_nchw, w_sign, scale, K=K, stride=stride,
                            padding=padding, H_out=H_out, W_out=W_out)
    # Wide channels, stride 1: shift-and-accumulate, no im2col traffic.
    return _conv_shift_acc(x_nchw, w_sign, scale, K=K, padding=padding,
                           H_out=H_out, W_out=W_out)


def _reference(x_nchw, weight_oihw, *, stride=1, padding=1):
    """Pure-JAX f32 reference mirroring the PyTorch forward."""
    w = weight_oihw
    scale = jnp.mean(jnp.abs(w), axis=(1, 2, 3), keepdims=True)
    w_bin = scale * jnp.sign(w)
    return lax.conv_general_dilated(
        x_nchw, w_bin, window_strides=(stride, stride),
        padding=[(padding, padding), (padding, padding)],
        dimension_numbers=("NCHW", "OIHW", "NCHW"))


if __name__ == "__main__":
    key = jax.random.PRNGKey(0)
    k1, k2, k3, k4 = jax.random.split(key, 4)

    # 1) Module-spec shapes (in_chn=4, out_chn=8, k=3, stride=1, pad=1) — im2col path.
    x1 = jax.random.normal(k1, (2, 4, 16, 16), dtype=jnp.float32)
    w1 = jax.random.uniform(k2, (8, 4, 3, 3), dtype=jnp.float32) * 0.001
    y1 = jax.block_until_ready(hard_binary_conv(x1, w1, stride=1, padding=1))
    y1_ref = _reference(x1, w1, stride=1, padding=1)
    assert y1.shape == (2, 8, 16, 16), y1.shape
    # Activations feed the MXU in bf16 (weights are exact +/-1, scale in f32),
    # so tolerance reflects the bf16 activation cast, not f32 bit-parity.
    assert jnp.allclose(y1, y1_ref, atol=2e-4, rtol=2e-2), (
        float(jnp.max(jnp.abs(y1 - y1_ref))))

    # 2) Wider-channel layer (signed weights) — shift-and-accumulate path.
    x2 = jax.random.normal(k3, (2, 64, 8, 8), dtype=jnp.float32)
    w2 = jax.random.normal(k4, (64, 64, 3, 3), dtype=jnp.float32) * 0.001
    y2 = jax.block_until_ready(hard_binary_conv(x2, w2, stride=1, padding=1))
    y2_ref = _reference(x2, w2, stride=1, padding=1)
    assert y2.shape == (2, 64, 8, 8), y2.shape
    assert jnp.allclose(y2, y2_ref, atol=5e-4, rtol=2e-2), (
        float(jnp.max(jnp.abs(y2 - y2_ref))))

    print("KERNEL_OK")
</pallas_src>

<mosaic_0001>
module attributes {stable_mosaic.version = 11 : i64} {
  func.func @_matmul_scale_kernel(%arg0: i32, %arg1: i32, %arg2: memref<1x256x128xbf16, #tpu.memory_space<vmem>>, %arg3: memref<128x128xbf16, #tpu.memory_space<vmem>>, %arg4: memref<1x128xf32, #tpu.memory_space<vmem>>, %arg5: memref<1x256x128xf32, #tpu.memory_space<vmem>>) attributes {dimension_semantics = [#tpu.dimension_semantics<parallel>, #tpu.dimension_semantics<parallel>], iteration_bounds = array<i64: 2, 1>, scalar_prefetch = 0 : i64, scratch_operands = 0 : i64, tpu.core_type = #tpu.core_type<tc>, window_params = [{transform_indices = @transform_0, window_bounds = array<i64: 1, 256, 128>}, {pipeline_mode = #tpu.pipeline_mode<synchronous>, transform_indices = @transform_1, window_bounds = array<i64: 128, 128>}, {pipeline_mode = #tpu.pipeline_mode<synchronous>, transform_indices = @transform_2, window_bounds = array<i64: 1, 128>}, {transform_indices = @transform_3, window_bounds = array<i64: 1, 256, 128>}]} {
    %c0 = arith.constant 0 : index
    %c0_0 = arith.constant 0 : index
    %c0_1 = arith.constant 0 : index
    %0 = vector.load %arg2[%c0, %c0_0, %c0_1] : memref<1x256x128xbf16, #tpu.memory_space<vmem>>, vector<1x256x128xbf16>
    %1 = vector.shape_cast %0 : vector<1x256x128xbf16> to vector<256x128xbf16>
    %c0_2 = arith.constant 0 : index
    %c0_3 = arith.constant 0 : index
    %2 = vector.load %arg3[%c0_2, %c0_3] : memref<128x128xbf16, #tpu.memory_space<vmem>>, vector<128x128xbf16>
    %cst = arith.constant dense<0.000000e+00> : vector<256x128xf32>
    %3 = tpu.matmul %1, %2, %cst {dimension_numbers = #tpu.dot_dimension_numbers<[1], [0], [0], [1], [0, 0, 1, 1], [], []>} : vector<256x128xbf16>, vector<128x128xbf16>, vector<256x128xf32> -> vector<256x128xf32>
    %c0_4 = arith.constant 0 : index
    %c0_5 = arith.constant 0 : index
    %4 = vector.load %arg4[%c0_4, %c0_5] : memref<1x128xf32, #tpu.memory_space<vmem>>, vector<1x128xf32>
    %5 = vector.broadcast %4 : vector<1x128xf32> to vector<256x128xf32>
    %6 = arith.mulf %3, %5 : vector<256x128xf32>
    %c0_6 = arith.constant 0 : index
    %c0_7 = arith.constant 0 : index
    %c0_8 = arith.constant 0 : index
    %7 = vector.load %arg5[%c0_6, %c0_7, %c0_8] : memref<1x256x128xf32, #tpu.memory_space<vmem>>, vector<1x256x128xf32>
    %8 = vector.shape_cast %7 : vector<1x256x128xf32> to vector<256x128xf32>
    %9 = vector.shape_cast %6 : vector<256x128xf32> to vector<1x256x128xf32>
    tpu.vector_store %arg5[%c0_6, %c0_7, %c0_8], %9 {strides = array<i32>} : memref<1x256x128xf32, #tpu.memory_space<vmem>>, vector<1x256x128xf32>,
    return
  }
  func.func @transform_0(%arg0: i32, %arg1: i32) -> (i32, i32, i32) {
    %c0_i32 = arith.constant 0 : i32
    %c0_i32_0 = arith.constant 0 : i32
    return %arg0, %arg1, %c0_i32 : i32, i32, i32
  }
  func.func @transform_1(%arg0: i32, %arg1: i32) -> (i32, i32) {
    %c0_i32 = arith.constant 0 : i32
    %c0_i32_0 = arith.constant 0 : i32
    %c0_i32_1 = arith.constant 0 : i32
    return %c0_i32, %c0_i32_0 : i32, i32
  }
  func.func @transform_2(%arg0: i32, %arg1: i32) -> (i32, i32) {
    %c0_i32 = arith.constant 0 : i32
    %c0_i32_0 = arith.constant 0 : i32
    %c0_i32_1 = arith.constant 0 : i32
    return %c0_i32, %c0_i32_0 : i32, i32
  }
  func.func @transform_3(%arg0: i32, %arg1: i32) -> (i32, i32, i32) {
    %c0_i32 = arith.constant 0 : i32
    %c0_i32_0 = arith.constant 0 : i32
    return %arg0, %arg1, %c0_i32 : i32, i32, i32
  }
}

</mosaic_0001>

<bundles_post_ra>
// kernel: tpu_custom_call.1
= control target key start
LH: loop header
LB: loop body
LE: loop exit
PB: predicated region body
PF: predicated region fallthrough
CT: control target
= control target key end

     0   :  { %s1352_s0 = inlined_call_operand.hbm [shape: bf16[2,256,128], index: 0, kind: input, shape index: {}]   ;;  %s1353_s1 = inlined_call_operand.hbm [shape: bf16[128,128], index: 1, kind: input, shape index: {}]   ;;  %s1354_s2 = inlined_call_operand.vmem [shape: f32[1,128], index: 2, kind: input, shape index: {}]   ;;  %s1355_s3 = inlined_call_operand.hbm [shape: f32[2,256,128], index: 3, kind: output, shape index: {}]  }
   0x1   :  { %1357 = sst [smem:[#allocation11_spill]] %s1353_s1 }
   0x2   :  { %8 = vsyncpa [#allocation3], 0 }
   0x3   :  { %10 = vsyncpa [#allocation3 + $0x1], 0 }
   0x4   :  { %11 = vsyncpa [#allocation6], 0 }
   0x5   :  { %12 = vsyncpa [#allocation4], 0 }
   0x6   :  { %14 = vsyncpa [#allocation4 + $0x1], 0  ;;  %s1106_s12 = smov 0   ;;  %s1108_s13 = smov 0  }
   0x7   :  { %s1110_s14 = smov 0   ;;  %s1112_s15 = smov 0  }
   0x8   :  { %s1114_s16 = smov 0   ;;  %s1116_s17 = smov 0  }
   0x9 LB: > { %s692_s18 = sadd.s32 4294967295, %s1079_s17   ;;  %s693_s19 = sadd.s32 4294967294, %s1079_s17   ;;  %s1079_s17 = sphi %s1116_s17, %s20_s17   ;;  %s1075_s16 = sphi %s1114_s16, %s1371_s16   ;;  %s1071_s15 = sphi %s1112_s15, %s1370_s15   ;;  %s1067_s14 = sphi %s1110_s14, %s1369_s14   ;;  %s1063_s13 = sphi %s1108_s13, %s1368_s13   ;;  %s1059_s12 = sphi %s1106_s12, %s1367_s12  }
   0xa   : > { %p54_p0 = scmp.ne.s32.totalorder %s1063_s13, %s1059_s12  ;;  %p1140_p1 = scmp.eq.s32.totalorder %s692_s18, 0 }
   0xb   : > { %p1144_p2 = scmp.eq.s32.totalorder %s692_s18, 1  ;;  %p128_p3 = scmp.eq.s32.totalorder %s693_s19, 1 }
   0xc   : > { %p1150_p4 = por %p1140_p1, %p54_p0  ;;  %p694_p5 = scmp.ge.s32.totalorder %s1079_s17, 1 }
   0xd   : > { %p1155_p6 = por %p128_p3, %p54_p0  ;;  %p135_p7 = scmp.lt.s32.totalorder %s1079_s17, 3 }
   0xe   : > { %s1362_s1 = sld [smem:[#allocation11_spill]]  ;;  %s1081_s28 = smov [#allocation5]  }
   0xf   : > { %p1163_p8 = pnand %p694_p5, %p135_p7  ;;  %s148_s29 = sshll.u32 %s1081_s28, 4  ;;  %s149_s29 = int_to_ptr.vmem [resolvable:$true] %s148_s29 }
  0x10   : > { %p696_p11 = scmp.ge.s32.totalorder %s1079_s17, 2  ;;  %s1356_s30 = smov 64  }
  0x11   : > { %p863_p9 = pneg %p1163_p8  ;;  %s1083_s4 = smov 4  }
  0x12   : > { %s32_s5 = sadd.s32 1, %s1075_s16  ;;  %s41_s6 = sadd.s32 1, %s1067_s14 }
  0x13   : > { %p864_p10 = pnand %p863_p9, %p1140_p1  ;;  %p34_p12 = scmp.ge.s32.totalorder %s32_s5, 2 }
  0x14   : > { %s146_s26 = sshll.u32 %s1362_s1, 4  ;;  %p48_p13 = scmp.ne.s32.totalorder %s1067_s14, %s1063_s13  ;;  %s147_s26 = int_to_ptr.hbm [resolvable:$true] %s146_s26 }
  0x15   : > { %866 = dma.hbm_to_vmem [thread:$0]  (!%p864_p10), %s147_s26, 1024, %s149_s29, [#allocation6], %s1356_s30, %s1356_s30, %s1083_s4  }
  0x16   : > { %p49_p0 = scmp.eq.s32.totalorder %s1079_s17, 0  ;;  %s1373_s5 = smov (%p34_p12, %s32_s5), 0 }
  0x17   : > { %p1188_p5 = por %p1144_p2, %p48_p13  ;;  %s36_s9 = ssub.s32 %s1075_s16, %s1373_s5 }
  0x18   : > { %p1182_p3 = por %p49_p0, %p48_p13  ;;  %p876_p7 = scmp.lt.s32.totalorder %s1079_s17, 2 }
  0x19   : > { %p39_p9 = scmp.eq.s32.totalorder %s36_s9, 0  ;;  %s165_s10 = sand.u32 1, %s1067_s14  }
  0x1a   : > { %s697_s11 = sshll.u32 %s165_s10, 7  ;;  %s805_s19 = sshll.u32 %s1075_s16, 7 }
  0x1b   : > { %s1197_s18 = scalar_select %p39_p9, %s1067_s14, %s41_s6  }
  0x1c   : > { %s176_s26 = scalar_lea.hbm %s1352_s0, %s805_s19  ;;  %s169_s28 = scalar_lea.vmem [#allocation2], %s697_s11 }
  0x1d   : > { %s179_s29 = sshll.u32 %s169_s28, 4  ;;  %s177_s21 = sshll.u32 %s176_s26, 4  ;;  %s180_s29 = int_to_ptr.vmem [resolvable:$true] %s179_s29  ;;  %s178_s21 = int_to_ptr.hbm [resolvable:$true] %s177_s21 }
  0x1e   : > { %p868_p2 = pnand %p876_p7, %p1182_p3  ;;  %s166_s30 = scalar_lea.sflag [#allocation3], %s165_s10 }
  0x1f   : > { %s1366_s1 = smov 64   ;;  %191 = sbr.rel (%p1163_p8) target bundleno = 267 (0x10b), region = 32 }
  0x20   : > { %870 = dma.hbm_to_vmem [thread:$0]  (!%p868_p2), %s178_s21, 2048, %s180_s29, %s166_s30, %s1366_s1, %s1366_s1, %s1083_s4  }
  0x21   : > { %s1211_s6 = sand.u32 (!%p1163_p8), 1, %s1063_s13  }
  0x22   : > { %s701_s9 = sshll.u32 (!%p1163_p8), %s1211_s6, 7  ;;  %s194_s11 = scalar_lea.sflag (!%p1163_p8), [#allocation3], %s1211_s6 }
  0x23   : > { %s1215_s19 = scalar_lea.vmem (!%p1163_p8), [#allocation2], %s701_s9 }
  0x24   : > { %1046 = dma.done.wait (%p1150_p4), %s194_s11, 2048  }
  0x25   : > { %1048 = vsyncadd (%p1150_p4), %s194_s11, 4294965248 }
  0x26   : > { %1050 = dma.done.wait (%p1140_p1), [#allocation6], 1024  }
  0x27   : > { %1052 = vsyncadd (%p1140_p1), [#allocation6], 4294966272  ;;  %v829_v0 = vld [vmem:[#allocation5 + $0x38] sm:$0xff]  ;;  %v828_v1 = vld [vmem:[#allocation5 + $0x30] sm:$0xff]  ;;  %s703_s1 = sshll.u32 %s1211_s6, 8  ;;  %s830_s30 = sshll.u32 %s1071_s15, 8 }
  0x28   : > { %420 = vmatpush.bf16.msra.mxu0 %v829_v0  ;;  %831 = vmatpush.bf16.msra.mxu1 %v829_v0  ;;  %v827_v2 = vld [vmem:[#allocation5 + $0x28] sm:$0xff]  ;;  %v826_v3 = vld [vmem:[#allocation5 + $0x20] sm:$0xff]  ;;  %v825_v4 = vld [vmem:[#allocation5 + $0x18] sm:$0xff]  ;;  %s1249_s27 = scalar_lea.vmem [#allocation7], %s703_s1  ;;  %s591_s10 = scalar_lea.hbm %s1355_s3, %s830_s30 }
  0x29   : > { %832 = vmatpush.bf16.msra.mxu2 %v829_v0  ;;  %833 = vmatpush.bf16.msra.mxu3 %v829_v0  ;;  %v824_v5 = vld [vmem:[#allocation5 + $0x10] sm:$0xff]  ;;  %v823_v6 = vld [vmem:[#allocation5 + $0x8] sm:$0xff]  ;;  %v822_v7 = vld [vmem:[#allocation5] sm:$0xff]  ;;  %s592_s15 = sshll.u32 %s1249_s27, 4  ;;  %s594_s24 = sshll.u32 %s591_s10, 4  ;;  %s593_s15 = int_to_ptr.vmem [resolvable:$true] %s592_s15  ;;  %s595_s24 = int_to_ptr.hbm [resolvable:$true] %s594_s24 }
  0x2a   : > { %v806_v8 = vld [vmem:[%s1215_s19] sm:$0xff]  ;;  %v807_v12 = vld [vmem:[%s1215_s19 + $0x8] sm:$0xff]  ;;  %v808_v16 = vld [vmem:[%s1215_s19 + $0x10] sm:$0xff]  ;;  %s578_s25 = scalar_lea.sflag [#allocation4], %s1211_s6  ;;  %s1007_s26 = sshra.s32 %s595_s24, 4  ;;  %s1008_s26 = int_to_ptr.hbm [resolvable:$true] %s1007_s26 }
  0x2b   : > { %v810_v9 = vld [vmem:[%s1215_s19 + $0x20] sm:$0xff]  ;;  %v811_v13 = vld [vmem:[%s1215_s19 + $0x28] sm:$0xff]  ;;  %v812_v17 = vld [vmem:[%s1215_s19 + $0x30] sm:$0xff]  ;;  %s1009_s28 = scalar_lea.hbm %s1008_s26, 256  ;;  %s1013_s9 = scalar_lea.hbm %s1355_s3, 512 }
  0x2c   : > { %421 = vmatpush.bf16.msra.mxu0 %v828_v1  ;;  %834 = vmatpush.bf16.msra.mxu1 %v828_v1  ;;  %v814_v10 = vld [vmem:[%s1215_s19 + $0x40] sm:$0xff]  ;;  %v815_v14 = vld [vmem:[%s1215_s19 + $0x48] sm:$0xff]  ;;  %v816_v18 = vld [vmem:[%s1215_s19 + $0x50] sm:$0xff]  ;;  %p1010_p1 = scmp.ne.s32.totalorder %s1008_s26, %s1009_s28  ;;  %p1014_p10 = scmp.lt.s32.totalorder %s1008_s26, %s1355_s3 }
  0x2d   : > { %835 = vmatpush.bf16.msra.mxu2 %v828_v1  ;;  %836 = vmatpush.bf16.msra.mxu3 %v828_v1  ;;  %v818_v11 = vld [vmem:[%s1215_s19 + $0x60] sm:$0xff]  ;;  %v819_v15 = vld [vmem:[%s1215_s19 + $0x68] sm:$0xff]  ;;  %v820_v19 = vld [vmem:[%s1215_s19 + $0x70] sm:$0xff]  ;;  %p1015_p12 = scmp.lt.s32.totalorder %s1013_s9, %s1009_s28 }
  0x2e   : > { %v809_v20 = vld [vmem:[%s1215_s19 + $0x18] sm:$0xff]  ;;  %v1245_v24 = vld [vmem:[%s1354_s2] ss:$0 sm:$0xff]  ;;  %p1011_p4 = pnand %p1010_p1, %p1188_p5 }
  0x2f   : > { %v813_v21 = vld [vmem:[%s1215_s19 + $0x38] sm:$0xff]  ;;  %p1016_p13 = por %p1015_p12, %p1014_p10 }
  0x30   : > { %422 = vmatpush.bf16.msra.mxu0 %v827_v2  ;;  %837 = vmatpush.bf16.msra.mxu1 %v827_v2  ;;  %v817_v22 = vld [vmem:[%s1215_s19 + $0x58] sm:$0xff]  ;;  %p1012_p8 = pneg %p1011_p4 }
  0x31   : > { %838 = vmatpush.bf16.msra.mxu2 %v827_v2  ;;  %839 = vmatpush.bf16.msra.mxu3 %v827_v2  ;;  %v821_v23 = vld [vmem:[%s1215_s19 + $0x78] sm:$0xff] }
  0x32   : > { %p1017_p0 = pnand %p1016_p13, %p1012_p8 }
  0x34   : > { %423 = vmatpush.bf16.msra.mxu0 %v826_v3  ;;  %840 = vmatpush.bf16.msra.mxu1 %v826_v3 }
  0x35   : > { %841 = vmatpush.bf16.msra.mxu2 %v826_v3  ;;  %842 = vmatpush.bf16.msra.mxu3 %v826_v3 }
  0x38   : > { %424 = vmatpush.bf16.msra.mxu0 %v825_v4  ;;  %843 = vmatpush.bf16.msra.mxu1 %v825_v4 }
  0x39   : > { %844 = vmatpush.bf16.msra.mxu2 %v825_v4  ;;  %845 = vmatpush.bf16.msra.mxu3 %v825_v4 }
  0x3c   : > { %425 = vmatpush.bf16.msra.mxu0 %v824_v5  ;;  %846 = vmatpush.bf16.msra.mxu1 %v824_v5 }
  0x3d   : > { %847 = vmatpush.bf16.msra.mxu2 %v824_v5  ;;  %848 = vmatpush.bf16.msra.mxu3 %v824_v5 }
  0x40   : > { %426 = vmatpush.bf16.msra.mxu0 %v823_v6  ;;  %849 = vmatpush.bf16.msra.mxu1 %v823_v6 }
  0x41   : > { %850 = vmatpush.bf16.msra.mxu2 %v823_v6  ;;  %851 = vmatpush.bf16.msra.mxu3 %v823_v6 }
  0x44   : > { %427 = vmatpush.bf16.msra.mxu0 %v822_v7  ;;  %852 = vmatpush.bf16.msra.mxu1 %v822_v7 }
  0x45   : > { %853 = vmatpush.bf16.msra.mxu2 %v822_v7  ;;  %854 = vmatpush.bf16.msra.mxu3 %v822_v7 }
  0x47   : > { %428 = vmatmul.bf16.vlgmr.msra.gmra.mxu0 %v806_v8  ;;  %448 = vmatmul.bf16.vlgmr.msra.gmra.mxu1 %v810_v9 }
  0x48   : > { %468 = vmatmul.bf16.vlgmr.msra.gmra.mxu2 %v814_v10  ;;  %488 = vmatmul.bf16.vlgmr.msra.gmra.mxu3 %v818_v11 }
  0x57   : > { %433 = vmatmul.bf16.gmra.mxu0 %v807_v12  ;;  %453 = vmatmul.bf16.gmra.mxu1 %v811_v13 }
  0x58   : > { %473 = vmatmul.bf16.gmra.mxu2 %v815_v14  ;;  %493 = vmatmul.bf16.gmra.mxu3 %v819_v15 }
  0x67   : > { %438 = vmatmul.bf16.gmra.mxu0 %v808_v16  ;;  %458 = vmatmul.bf16.gmra.mxu1 %v812_v17 }
  0x68   : > { %478 = vmatmul.bf16.gmra.mxu2 %v816_v18  ;;  %498 = vmatmul.bf16.gmra.mxu3 %v820_v19 }
  0x77   : > { %443 = vmatmul.bf16.gmra.mxu0 %v809_v20  ;;  %463 = vmatmul.bf16.gmra.mxu1 %v813_v21 }
  0x78   : > { %483 = vmatmul.bf16.gmra.mxu2 %v817_v22  ;;  %503 = vmatmul.bf16.gmra.mxu3 %v821_v23 }
  0xc4   : > { %v429_v25 = vpop.f32.mrf.mxu0  ;;  %v449_v26 = vpop.f32.mrf.mxu1 }
  0xc5   : > { %v513_v27 = vmul.f32 %v1245_v24, %v429_v25  ;;  %v521_v28 = vmul.f32 %v1245_v24, %v449_v26 }
  0xc7   : > { %545 = vst [vmem:[%s1249_s27] sm:$0xff] %v513_v27 }
  0xc8   : > { %553 = vst [vmem:[%s1249_s27 + $0x40] sm:$0xff] %v521_v28 }
  0xcb   : > { %v469_v29 = vpop.f32.mrf.mxu2  ;;  %v489_v30 = vpop.f32.mrf.mxu3 }
  0xcc   : > { %v529_v31 = vmul.f32 %v1245_v24, %v469_v29  ;;  %v537_v32 = vmul.f32 %v1245_v24, %v489_v30  ;;  %v431_v33 = vpop.f32.mrf.mxu0  ;;  %v451_v34 = vpop.f32.mrf.mxu1 }
  0xcd   : > { %v514_v35 = vmul.f32 %v1245_v24, %v431_v33  ;;  %v522_v36 = vmul.f32 %v1245_v24, %v451_v34 }
  0xce   : > { %561 = vst [vmem:[%s1249_s27 + $0x80] sm:$0xff] %v529_v31 }
  0xcf   : > { %569 = vst [vmem:[%s1249_s27 + $0xc0] sm:$0xff] %v537_v32 }
  0xd0   : > { %546 = vst [vmem:[%s1249_s27 + $0x8] sm:$0xff] %v514_v35 }
  0xd1   : > { %554 = vst [vmem:[%s1249_s27 + $0x48] sm:$0xff] %v522_v36 }
  0xd3   : > { %v471_v37 = vpop.f32.mrf.mxu2  ;;  %v491_v38 = vpop.f32.mrf.mxu3 }
  0xd4   : > { %v530_v39 = vmul.f32 %v1245_v24, %v471_v37  ;;  %v538_v40 = vmul.f32 %v1245_v24, %v491_v38  ;;  %v434_v41 = vpop.f32.mrf.mxu0  ;;  %v454_v42 = vpop.f32.mrf.mxu1 }
  0xd5   : > { %v515_v43 = vmul.f32 %v1245_v24, %v434_v41  ;;  %v523_v44 = vmul.f32 %v1245_v24, %v454_v42 }
  0xd6   : > { %562 = vst [vmem:[%s1249_s27 + $0x88] sm:$0xff] %v530_v39 }
  0xd7   : > { %570 = vst [vmem:[%s1249_s27 + $0xc8] sm:$0xff] %v538_v40 }
  0xd8   : > { %547 = vst [vmem:[%s1249_s27 + $0x10] sm:$0xff] %v515_v43 }
  0xd9   : > { %555 = vst [vmem:[%s1249_s27 + $0x50] sm:$0xff] %v523_v44 }
  0xdb   : > { %v474_v45 = vpop.f32.mrf.mxu2  ;;  %v494_v46 = vpop.f32.mrf.mxu3 }
  0xdc   : > { %v531_v47 = vmul.f32 %v1245_v24, %v474_v45  ;;  %v539_v48 = vmul.f32 %v1245_v24, %v494_v46  ;;  %v436_v49 = vpop.f32.mrf.mxu0  ;;  %v456_v50 = vpop.f32.mrf.mxu1 }
  0xdd   : > { %v516_v51 = vmul.f32 %v1245_v24, %v436_v49  ;;  %v524_v52 = vmul.f32 %v1245_v24, %v456_v50 }
  0xde   : > { %563 = vst [vmem:[%s1249_s27 + $0x90] sm:$0xff] %v531_v47 }
  0xdf   : > { %571 = vst [vmem:[%s1249_s27 + $0xd0] sm:$0xff] %v539_v48 }
  0xe0   : > { %548 = vst [vmem:[%s1249_s27 + $0x18] sm:$0xff] %v516_v51 }
  0xe1   : > { %556 = vst [vmem:[%s1249_s27 + $0x58] sm:$0xff] %v524_v52 }
  0xe3   : > { %v476_v53 = vpop.f32.mrf.mxu2  ;;  %v496_v54 = vpop.f32.mrf.mxu3 }
  0xe4   : > { %v532_v55 = vmul.f32 %v1245_v24, %v476_v53  ;;  %v540_v56 = vmul.f32 %v1245_v24, %v496_v54  ;;  %v439_v57 = vpop.f32.mrf.mxu0  ;;  %v459_v58 = vpop.f32.mrf.mxu1 }
  0xe5   : > { %v517_v59 = vmul.f32 %v1245_v24, %v439_v57  ;;  %v525_v60 = vmul.f32 %v1245_v24, %v459_v58 }
  0xe6   : > { %564 = vst [vmem:[%s1249_s27 + $0x98] sm:$0xff] %v532_v55 }
  0xe7   : > { %572 = vst [vmem:[%s1249_s27 + $0xd8] sm:$0xff] %v540_v56 }
  0xe8   : > { %549 = vst [vmem:[%s1249_s27 + $0x20] sm:$0xff] %v517_v59 }
  0xe9   : > { %557 = vst [vmem:[%s1249_s27 + $0x60] sm:$0xff] %v525_v60 }
  0xeb   : > { %v479_v61 = vpop.f32.mrf.mxu2  ;;  %v499_v62 = vpop.f32.mrf.mxu3 }
  0xec   : > { %v533_v63 = vmul.f32 %v1245_v24, %v479_v61  ;;  %v541_v0 = vmul.f32 %v1245_v24, %v499_v62  ;;  %v441_v1 = vpop.f32.mrf.mxu0  ;;  %v461_v2 = vpop.f32.mrf.mxu1 }
  0xed   : > { %v518_v3 = vmul.f32 %v1245_v24, %v441_v1  ;;  %v526_v4 = vmul.f32 %v1245_v24, %v461_v2 }
  0xee   : > { %565 = vst [vmem:[%s1249_s27 + $0xa0] sm:$0xff] %v533_v63 }
  0xef   : > { %573 = vst [vmem:[%s1249_s27 + $0xe0] sm:$0xff] %v541_v0 }
  0xf0   : > { %550 = vst [vmem:[%s1249_s27 + $0x28] sm:$0xff] %v518_v3 }
  0xf1   : > { %558 = vst [vmem:[%s1249_s27 + $0x68] sm:$0xff] %v526_v4 }
  0xf3   : > { %v481_v5 = vpop.f32.mrf.mxu2  ;;  %v501_v6 = vpop.f32.mrf.mxu3 }
  0xf4   : > { %v534_v7 = vmul.f32 %v1245_v24, %v481_v5  ;;  %v542_v8 = vmul.f32 %v1245_v24, %v501_v6  ;;  %v444_v9 = vpop.f32.mrf.mxu0  ;;  %v464_v10 = vpop.f32.mrf.mxu1 }
  0xf5   : > { %v519_v11 = vmul.f32 %v1245_v24, %v444_v9  ;;  %v527_v12 = vmul.f32 %v1245_v24, %v464_v10 }
  0xf6   : > { %566 = vst [vmem:[%s1249_s27 + $0xa8] sm:$0xff] %v534_v7 }
  0xf7   : > { %574 = vst [vmem:[%s1249_s27 + $0xe8] sm:$0xff] %v542_v8 }
  0xf8   : > { %551 = vst [vmem:[%s1249_s27 + $0x30] sm:$0xff] %v519_v11 }
  0xf9   : > { %559 = vst [vmem:[%s1249_s27 + $0x70] sm:$0xff] %v527_v12 }
  0xfb   : > { %v484_v13 = vpop.f32.mrf.mxu2  ;;  %v504_v14 = vpop.f32.mrf.mxu3 }
  0xfc   : > { %v535_v15 = vmul.f32 %v1245_v24, %v484_v13  ;;  %v543_v16 = vmul.f32 %v1245_v24, %v504_v14  ;;  %v446_v17 = vpop.f32.mrf.mxu0  ;;  %v466_v18 = vpop.f32.mrf.mxu1 }
  0xfd   : > { %v520_v19 = vmul.f32 %v1245_v24, %v446_v17  ;;  %v528_v20 = vmul.f32 %v1245_v24, %v466_v18 }
  0xfe   : > { %567 = vst [vmem:[%s1249_s27 + $0xb0] sm:$0xff] %v535_v15 }
  0xff   : > { %575 = vst [vmem:[%s1249_s27 + $0xf0] sm:$0xff] %v543_v16 }
 0x100   : > { %552 = vst [vmem:[%s1249_s27 + $0x38] sm:$0xff] %v520_v19 }
 0x101   : > { %560 = vst [vmem:[%s1249_s27 + $0x78] sm:$0xff] %v528_v20 }
 0x103   : > { %v486_v21 = vpop.f32.mrf.mxu2  ;;  %v506_v22 = vpop.f32.mrf.mxu3 }
 0x104   : > { %v536_v23 = vmul.f32 %v1245_v24, %v486_v21  ;;  %v544_v25 = vmul.f32 %v1245_v24, %v506_v22 }
 0x106   : > { %568 = vst [vmem:[%s1249_s27 + $0xb8] sm:$0xff] %v536_v23 }
 0x107   : > { %576 = vst [vmem:[%s1249_s27 + $0xf8] sm:$0xff] %v544_v25 }
 0x108   : > { %1020 = shalt.err (!%p1017_p0)
}
 0x109   : > { %s1084_s6 = smov 128   ;;  %s1085_s1 = smov 8  }
 0x10a   : > { %861 = dma.vmem_to_hbm [thread:$0]  (%p1188_p5), %s593_s15, 4096, %s595_s24, %s578_s25, %s1084_s6, %s1084_s6, %s1085_s1  }
 0x10b PF: > { %s609_s20 = sand.u32 1, %s1059_s12   ;;  %p872_p3 = pnand %p696_p11, %p1155_p6 }
 0x10c   : > { %s610_s22 = scalar_lea.sflag [#allocation4], %s609_s20 }
 0x10d   : > { %p873_p7 = pneg %p872_p3 }
 0x10f   : > { %1054 = dma.done.wait (%p873_p7), %s610_s22, 4096  }
 0x110   : > { %1056 = vsyncadd (%p873_p7), %s610_s22, 4294963200  ;;  %s20_s17 = sadd.s32 1, %s1079_s17   ;;  %s1367_s12 = smov %s1063_s13 }
 0x111   : > { %p17_p9 = scmp.ge.s32.totalorder %s20_s17, 4   ;;  %s1368_s13 = smov %s1067_s14 }
 0x112   : > { %s1369_s14 = smov %s1197_s18  ;;  %s1370_s15 = smov %s1075_s16 }
 0x113   : > { %s1371_s16 = smov %s1373_s5  ;;  %19 = sbr.rel (!%p17_p9) target bundleno = 9 (0x9), region = 81 }
 0x118   :  { %616 = vsyncpa [#allocation3], 1 }
 0x119   :  { %618 = vsyncpa [#allocation3 + $0x1], 1 }
 0x11a   :  { %619 = vsyncpa [#allocation6], 1 }
 0x11b   :  { %620 = vsyncpa [#allocation4], 1 }
 0x11c   :  { %622 = vsyncpa [#allocation4 + $0x1], 1 }

</bundles_post_ra>
